<compile_context>
chip_gen: v5e
topology: v5e:2x2
jax: 0.10.0
libtpu: 0.0.40
codegen_flags: <defaults>
</compile_context>

<pallas_src>
import functools

import jax
import jax.numpy as jnp
from jax.experimental import pallas as pl
from jax.experimental.pallas import tpu as pltpu


def hnn_mlp_kernel(xT_ref, w1T_ref, b1T_ref, w2T_ref, b2T_ref, w3T_ref, b3T_ref,
                   yT_ref, *, bf16_matmul=False):
    """One batch tile, feature-major (batch on the 128-wide lane axis).

    xT_ref : (D, tb)   input tile
    w1T    : (H, D)    b1T : (H, 1)
    w2T    : (H, H)    b2T : (H, 1)
    w3T    : (O, H)    b3T : (O, 1)
    yT_ref : (O, tb)   lane-dense output tile
    """
    xt = xT_ref[...]                      # (D, tb)
    w1t = w1T_ref[...]                    # (H, D)
    d_in = xt.shape[0]

    # Layer 1: K = D is tiny (2 canonical coords) -> VPU broadcast-FMA;
    # keeps the MXU free and only emits 2*D broadcasts total.
    acc = b1T_ref[...]                    # (H, 1) -> broadcasts over lanes
    for d in range(d_in):                 # static unroll (D is tiny)
        acc = acc + w1t[:, d:d + 1] * xt[d:d + 1, :]   # (H,1)*(1,tb) -> (H,tb)
    h1 = jnp.tanh(acc)                    # (H, tb), tanh on the EUP

    # Layer 2: H x H on the MXU; lanes are fully dense with batch.
    w2 = w2T_ref[...]
    lhs, rhs = (w2, h1)
    if bf16_matmul:                       # optional: native-bf16 MXU path
        lhs = lhs.astype(jnp.bfloat16)
        rhs = rhs.astype(jnp.bfloat16)
    h2 = jnp.tanh(
        jnp.dot(lhs, rhs, preferred_element_type=jnp.float32) + b2T_ref[...]
    )                                     # (H, tb)

    # Layer 3: tiny-M matmul (O = 2 rows); output stays lane-dense.
    y = (jnp.dot(w3T_ref[...], h2, preferred_element_type=jnp.float32)
         + b3T_ref[...])                  # (O, tb)
    yT_ref[...] = y.astype(yT_ref.dtype)


def _round_up(n, m):
    return ((n + m - 1) // m) * m


def hnn_forward(x, params, *, tb=2048, x_feature_major=False,
                split_outputs=True, bf16_matmul=False):
    """Pallas implementation of HNN.forward (non-baseline path).

    x: [B, D] (torch nn.Linear layout) or [D, B] if x_feature_major=True
       (preferred: avoids the wrapper-side transpose / extra HBM pass).
    Returns (F1, F2), each [B, 1] — equivalent to torch `y.split(1, 1)` —
    or the lane-dense (2, B) slab if split_outputs=False."""
    W1, b1, W2, b2, W3, b3 = params       # W: (in, out), b: (1, out)
    if x_feature_major:
        D, B = x.shape
        xT = x                            # already (D, B): zero wrapper passes
    else:
        B, D = x.shape
        xT = x.T                          # single wrapper pass; no jnp.pad
    H = W1.shape[1]
    O = W3.shape[1]

    # --- batch tile selection (sweepable) ---------------------------------
    tb = _round_up(max(int(tb), 128), 128)      # lane-dense multiple of 128
    tb = min(tb, _round_up(B, 128))             # don't exceed the batch
    if B >= 256:
        # Guarantee >= 2 grid steps so "parallel" can shard across the two
        # TensorCores on v7x (negligible cost on single-TC v5e/v6e).
        tb = min(tb, _round_up(pl.cdiv(B, 2), 128))
    n_steps = pl.cdiv(B, tb)
    Bp = n_steps * tb                           # padded OUTPUT size only

    # Per-step VMEM budget (generous: padded sublanes, double-buffered I/O,
    # resident weights, streamed h1/h2).  ~1.5 MiB at tb=4096 -> far below the
    # 32 MiB scoped default and v7x's 64 MiB physical VMEM.
    vmem_est = 4 * (2 * 8 * tb + 2 * 8 * tb + 2 * H * tb
                    + (H * D + H + H * H + H + O * H + O))
    assert vmem_est < 16 * 1024 * 1024, "tile too large for VMEM budget"

    # Feature-major weights (tiny, prepared once per call).
    W1T, b1T = W1.T, b1.T                 # (H, D), (H, 1)
    W2T, b2T = W2.T, b2.T                 # (H, H), (H, 1)
    W3T, b3T = W3.T, b3.T                 # (O, H), (O, 1)

    cost = pl.CostEstimate(
        flops=2 * B * (H * D + H * H + H * O),
        transcendentals=2 * H * B,
        bytes_accessed=4 * (B * (D + O) + H * D + H + H * H + H + O * H + O),
    )

    yT = pl.pallas_call(
        functools.partial(hnn_mlp_kernel, bf16_matmul=bool(bf16_matmul)),
        out_shape=jax.ShapeDtypeStruct((O, Bp), x.dtype),
        grid=(n_steps,),
        in_specs=[
            # Ragged last block: OOB input columns read garbage, but each
            # output column depends only on its own batch column, and those
            # columns land in the padded [B:Bp) output region (sliced off).
            pl.BlockSpec((D, tb), lambda i: (0, i)),   # x tile (batch on lanes)
            pl.BlockSpec((H, D), lambda i: (0, 0)),    # W1^T (resident)
            pl.BlockSpec((H, 1), lambda i: (0, 0)),    # b1^T
            pl.BlockSpec((H, H), lambda i: (0, 0)),    # W2^T
            pl.BlockSpec((H, 1), lambda i: (0, 0)),    # b2^T
            pl.BlockSpec((O, H), lambda i: (0, 0)),    # W3^T
            pl.BlockSpec((O, 1), lambda i: (0, 0)),    # b3^T
        ],
        out_specs=pl.BlockSpec((O, tb), lambda i: (0, i)),  # lane-dense output
        compiler_params=pltpu.CompilerParams(
            dimension_semantics=("parallel",)),        # megacore sharding (v7x)
        cost_estimate=cost,
    )(xT, W1T, b1T, W2T, b2T, W3T, b3T)

    y = yT[:, :B]                         # single slice of the (2, Bp) slab
    if not split_outputs:
        return y                          # (2, B) lane-dense slab
    # torch: return y.split(1, 1) -> (F1, F2), each [B, 1].
    return y[0].reshape(B, 1), y[1].reshape(B, 1)


def permutation_tensor(n, assume_canonical_coords=True):
    """HNN.permutation_tensor (canonical-coordinates branch), in plain JAX."""
    if assume_canonical_coords:
        M = jnp.eye(n, dtype=jnp.float32)
        return jnp.concatenate([M[n // 2:], -M[: n // 2]], axis=0)
    # TODO(synk): Levi-Civita branch not needed for forward(); omitted.
    raise NotImplementedError


def init_params(key, input_dim, hidden_dim, out_dim=2, dtype=jnp.float32):
    k1, k2, k3 = jax.random.split(key, 3)
    s1 = 1.0 / jnp.sqrt(input_dim)
    s2 = 1.0 / jnp.sqrt(hidden_dim)
    W1 = jax.random.uniform(k1, (input_dim, hidden_dim), dtype, -s1, s1)
    b1 = jnp.zeros((1, hidden_dim), dtype)
    W2 = jax.random.uniform(k2, (hidden_dim, hidden_dim), dtype, -s2, s2)
    b2 = jnp.zeros((1, hidden_dim), dtype)
    W3 = jax.random.uniform(k3, (hidden_dim, out_dim), dtype, -s2, s2)
    b3 = jnp.zeros((1, out_dim), dtype)
    return (W1, b1, W2, b2, W3, b3)


def reference_forward(x, params):
    W1, b1, W2, b2, W3, b3 = params
    h1 = jnp.tanh(x @ W1 + b1)
    h2 = jnp.tanh(h1 @ W2 + b2)
    y = h2 @ W3 + b3
    return y[:, 0:1], y[:, 1:2]


if __name__ == "__main__":
    input_dim = 2      # canonical coords (q, p)
    hidden_dim = 32

    key = jax.random.PRNGKey(0)
    kx, kx2, kp = jax.random.split(key, 3)
    params = init_params(kp, input_dim, hidden_dim)

    M = permutation_tensor(input_dim)  # built as in __init__ (unused in forward)

    # Small batch (not a multiple of 128 -> exercises the ragged single-step path).
    x_small = jax.random.normal(kx, (8, input_dim), dtype=jnp.float32)
    F1, F2 = hnn_forward(x_small, params)
    jax.block_until_ready((F1, F2))
    R1, R2 = reference_forward(x_small, params)
    assert F1.shape == (8, 1) and F2.shape == (8, 1)
    assert jnp.allclose(F1, R1, atol=1e-4) and jnp.allclose(F2, R2, atol=1e-4)

    # Larger batch (>=256 -> >=2 grid steps, ragged last block, megacore path).
    x_big = jax.random.normal(kx2, (300, input_dim), dtype=jnp.float32)
    G1, G2 = hnn_forward(x_big, params)
    jax.block_until_ready((G1, G2))
    S1, S2 = reference_forward(x_big, params)
    assert jnp.allclose(G1, S1, atol=1e-4) and jnp.allclose(G2, S2, atol=1e-4)

    # Feature-major fast path (no wrapper transpose) + stacked-slab output.
    y_slab = hnn_forward(jnp.asarray(x_big.T), params,
                         x_feature_major=True, split_outputs=False)
    jax.block_until_ready(y_slab)
    assert y_slab.shape == (2, 300)
    assert jnp.allclose(y_slab[0].reshape(-1, 1), S1, atol=1e-4)
    assert jnp.allclose(y_slab[1].reshape(-1, 1), S2, atol=1e-4)

    print("KERNEL_OK")
</pallas_src>

<mosaic_0001>
module attributes {stable_mosaic.version = 11 : i64} {
  func.func @hnn_mlp_kernel(%arg0: i32, %arg1: memref<2x128xf32, #tpu.memory_space<vmem>>, %arg2: memref<32x2xf32, #tpu.memory_space<vmem>>, %arg3: memref<32x1xf32, #tpu.memory_space<vmem>>, %arg4: memref<32x32xf32, #tpu.memory_space<vmem>>, %arg5: memref<32x1xf32, #tpu.memory_space<vmem>>, %arg6: memref<2x32xf32, #tpu.memory_space<vmem>>, %arg7: memref<2x1xf32, #tpu.memory_space<vmem>>, %arg8: memref<2x128xf32, #tpu.memory_space<vmem>>) attributes {dimension_semantics = [#tpu.dimension_semantics<parallel>], iteration_bounds = array<i64: 1>, scalar_prefetch = 0 : i64, scratch_operands = 0 : i64, tpu.core_type = #tpu.core_type<tc>, window_params = [{transform_indices = @transform_0, window_bounds = array<i64: 2, 128>}, {pipeline_mode = #tpu.pipeline_mode<synchronous>, transform_indices = @transform_1, window_bounds = array<i64: 32, 2>}, {pipeline_mode = #tpu.pipeline_mode<synchronous>, transform_indices = @transform_2, window_bounds = array<i64: 32, 1>}, {pipeline_mode = #tpu.pipeline_mode<synchronous>, transform_indices = @transform_3, window_bounds = array<i64: 32, 32>}, {pipeline_mode = #tpu.pipeline_mode<synchronous>, transform_indices = @transform_4, window_bounds = array<i64: 32, 1>}, {pipeline_mode = #tpu.pipeline_mode<synchronous>, transform_indices = @transform_5, window_bounds = array<i64: 2, 32>}, {pipeline_mode = #tpu.pipeline_mode<synchronous>, transform_indices = @transform_6, window_bounds = array<i64: 2, 1>}, {transform_indices = @transform_7, window_bounds = array<i64: 2, 128>}]} {
    %c0 = arith.constant 0 : index
    %c0_0 = arith.constant 0 : index
    %0 = vector.load %arg1[%c0, %c0_0] : memref<2x128xf32, #tpu.memory_space<vmem>>, vector<2x128xf32>
    %c0_1 = arith.constant 0 : index
    %c0_2 = arith.constant 0 : index
    %1 = vector.load %arg2[%c0_1, %c0_2] : memref<32x2xf32, #tpu.memory_space<vmem>>, vector<32x2xf32>
    %c0_3 = arith.constant 0 : index
    %c0_4 = arith.constant 0 : index
    %2 = vector.load %arg3[%c0_3, %c0_4] : memref<32x1xf32, #tpu.memory_space<vmem>>, vector<32x1xf32>
    %3 = vector.extract_strided_slice %1 {offsets = [0, 0], sizes = [32, 1], strides = [1, 1]} : vector<32x2xf32> to vector<32x1xf32>
    %4 = vector.extract_strided_slice %0 {offsets = [0, 0], sizes = [1, 128], strides = [1, 1]} : vector<2x128xf32> to vector<1x128xf32>
    %5 = vector.broadcast %3 : vector<32x1xf32> to vector<32x128xf32>
    %6 = vector.broadcast %4 : vector<1x128xf32> to vector<32x128xf32>
    %7 = arith.mulf %5, %6 : vector<32x128xf32>
    %8 = vector.broadcast %2 : vector<32x1xf32> to vector<32x128xf32>
    %9 = arith.addf %8, %7 : vector<32x128xf32>
    %10 = vector.extract_strided_slice %1 {offsets = [0, 1], sizes = [32, 1], strides = [1, 1]} : vector<32x2xf32> to vector<32x1xf32>
    %11 = vector.extract_strided_slice %0 {offsets = [1, 0], sizes = [1, 128], strides = [1, 1]} : vector<2x128xf32> to vector<1x128xf32>
    %12 = vector.broadcast %10 : vector<32x1xf32> to vector<32x128xf32>
    %13 = vector.broadcast %11 : vector<1x128xf32> to vector<32x128xf32>
    %14 = arith.mulf %12, %13 : vector<32x128xf32>
    %15 = arith.addf %9, %14 : vector<32x128xf32>
    %16 = math.tanh %15 : vector<32x128xf32>
    %c0_5 = arith.constant 0 : index
    %c0_6 = arith.constant 0 : index
    %17 = vector.load %arg4[%c0_5, %c0_6] : memref<32x32xf32, #tpu.memory_space<vmem>>, vector<32x32xf32>
    %cst = arith.constant dense<0.000000e+00> : vector<32x128xf32>
    %18 = tpu.matmul %17, %16, %cst {dimension_numbers = #tpu.dot_dimension_numbers<[1], [0], [0], [1], [0, 0, 1, 1], [], []>} : vector<32x32xf32>, vector<32x128xf32>, vector<32x128xf32> -> vector<32x128xf32>
    %c0_7 = arith.constant 0 : index
    %c0_8 = arith.constant 0 : index
    %19 = vector.load %arg5[%c0_7, %c0_8] : memref<32x1xf32, #tpu.memory_space<vmem>>, vector<32x1xf32>
    %20 = vector.broadcast %19 : vector<32x1xf32> to vector<32x128xf32>
    %21 = arith.addf %18, %20 : vector<32x128xf32>
    %22 = math.tanh %21 : vector<32x128xf32>
    %c0_9 = arith.constant 0 : index
    %c0_10 = arith.constant 0 : index
    %23 = vector.load %arg6[%c0_9, %c0_10] : memref<2x32xf32, #tpu.memory_space<vmem>>, vector<2x32xf32>
    %cst_11 = arith.constant dense<0.000000e+00> : vector<2x128xf32>
    %24 = tpu.matmul %23, %22, %cst_11 {dimension_numbers = #tpu.dot_dimension_numbers<[1], [0], [0], [1], [0, 0, 1, 1], [], []>} : vector<2x32xf32>, vector<32x128xf32>, vector<2x128xf32> -> vector<2x128xf32>
    %c0_12 = arith.constant 0 : index
    %c0_13 = arith.constant 0 : index
    %25 = vector.load %arg7[%c0_12, %c0_13] : memref<2x1xf32, #tpu.memory_space<vmem>>, vector<2x1xf32>
    %26 = vector.broadcast %25 : vector<2x1xf32> to vector<2x128xf32>
    %27 = arith.addf %24, %26 : vector<2x128xf32>
    %c0_14 = arith.constant 0 : index
    %c0_15 = arith.constant 0 : index
    %28 = vector.load %arg8[%c0_14, %c0_15] : memref<2x128xf32, #tpu.memory_space<vmem>>, vector<2x128xf32>
    tpu.vector_store %arg8[%c0_14, %c0_15], %27 {strides = array<i32>} : memref<2x128xf32, #tpu.memory_space<vmem>>, vector<2x128xf32>,
    return
  }
  func.func @transform_0(%arg0: i32) -> (i32, i32) {
    %c0_i32 = arith.constant 0 : i32
    %c0_i32_0 = arith.constant 0 : i32
    return %c0_i32, %arg0 : i32, i32
  }
  func.func @transform_1(%arg0: i32) -> (i32, i32) {
    %c0_i32 = arith.constant 0 : i32
    %c0_i32_0 = arith.constant 0 : i32
    %c0_i32_1 = arith.constant 0 : i32
    return %c0_i32, %c0_i32_0 : i32, i32
  }
  func.func @transform_2(%arg0: i32) -> (i32, i32) {
    %c0_i32 = arith.constant 0 : i32
    %c0_i32_0 = arith.constant 0 : i32
    %c0_i32_1 = arith.constant 0 : i32
    return %c0_i32, %c0_i32_0 : i32, i32
  }
  func.func @transform_3(%arg0: i32) -> (i32, i32) {
    %c0_i32 = arith.constant 0 : i32
    %c0_i32_0 = arith.constant 0 : i32
    %c0_i32_1 = arith.constant 0 : i32
    return %c0_i32, %c0_i32_0 : i32, i32
  }
  func.func @transform_4(%arg0: i32) -> (i32, i32) {
    %c0_i32 = arith.constant 0 : i32
    %c0_i32_0 = arith.constant 0 : i32
    %c0_i32_1 = arith.constant 0 : i32
    return %c0_i32, %c0_i32_0 : i32, i32
  }
  func.func @transform_5(%arg0: i32) -> (i32, i32) {
    %c0_i32 = arith.constant 0 : i32
    %c0_i32_0 = arith.constant 0 : i32
    %c0_i32_1 = arith.constant 0 : i32
    return %c0_i32, %c0_i32_0 : i32, i32
  }
  func.func @transform_6(%arg0: i32) -> (i32, i32) {
    %c0_i32 = arith.constant 0 : i32
    %c0_i32_0 = arith.constant 0 : i32
    %c0_i32_1 = arith.constant 0 : i32
    return %c0_i32, %c0_i32_0 : i32, i32
  }
  func.func @transform_7(%arg0: i32) -> (i32, i32) {
    %c0_i32 = arith.constant 0 : i32
    %c0_i32_0 = arith.constant 0 : i32
    return %c0_i32, %arg0 : i32, i32
  }
}

</mosaic_0001>

<bundles_post_ra>
// kernel: tpu_custom_call.1
= control target key start
LH: loop header
LB: loop body
LE: loop exit
PB: predicated region body
PF: predicated region fallthrough
CT: control target
= control target key end

     0   :  { %v302_v3 = vmov 0   ;;  %s410_s0 = inlined_call_operand.vmem [shape: f32[2,8], index: 0, kind: input, shape index: {}]   ;;  %s411_s1 = inlined_call_operand.vmem [shape: f32[32,2], index: 1, kind: input, shape index: {}]   ;;  %s412_s2 = inlined_call_operand.vmem [shape: f32[32,1], index: 2, kind: input, shape index: {}]   ;;  %s413_s3 = inlined_call_operand.vmem [shape: f32[32,32], index: 3, kind: input, shape index: {}]   ;;  %s414_s4 = inlined_call_operand.vmem [shape: f32[32,1], index: 4, kind: input, shape index: {}]   ;;  %s415_s5 = inlined_call_operand.vmem [shape: f32[2,32], index: 5, kind: input, shape index: {}]   ;;  %s416_s6 = inlined_call_operand.vmem [shape: f32[2,1], index: 6, kind: input, shape index: {}]   ;;  %s417_s7 = inlined_call_operand.hbm [shape: f32[2,128], index: 7, kind: output, shape index: {}]  }
   0x1   :  { %v35_v0 = vld [vmem:[%s412_s2 + $0x18] sm:$0xff]  ;;  %v29_v2 = vld [vmem:[%s411_s1 + $0x8] sm:$0xff]  ;;  %254 = vset.pattern.permute.xlu2 %v302_v3  ;;  %252 = vset.pattern.permute.xlu1 %v302_v3 }
   0x2   :  { %v31_v1 = vld [vmem:[%s411_s1 + $0x18] sm:$0xff]  ;;  %251 = vset.pattern.permute.xlu0 %v302_v3  ;;  %78 = vperm.xlu1 %252, %v35_v0  }
   0x3   :  { %53 = vperm.xlu0 %251, %v31_v1   ;;  %43 = vperm.xlu2 %254, %v29_v2  }
   0x4   :  { %12 = vsyncpa [#allocation3], 0  ;;  %v30_v4 = vld [vmem:[%s411_s1 + $0x10] sm:$0xff]  ;;  %v303_v6 = vmov 1   ;;  %v33_v7 = vld [vmem:[%s412_s2 + $0x8] sm:$0xff]  ;;  %vm142_vm0 = vcmask 261120  }
   0x5   :  { %v34_v5 = vld [vmem:[%s412_s2 + $0x10] sm:$0xff]  ;;  %v28_v8 = vld [vmem:[%s411_s1] sm:$0xff]  ;;  %v121_v31 = vld [vmem:[%s414_s4 + $0x18] sm:$0xff]  ;;  %s304_s10 = smov [#allocation2]   ;;  %s226_s14 = sshll.u32 %s417_s7, 4  ;;  %s227_s14 = int_to_ptr.hbm [resolvable:$true] %s226_s14 }
   0x6   :  { %v32_v9 = vld [vmem:[%s412_s2] sm:$0xff]  ;;  %v120_v10 = vld [vmem:[%s414_s4 + $0x10] sm:$0xff]  ;;  %v119_v34 = vld [vmem:[%s414_s4 + $0x8] sm:$0xff]  ;;  %s224_s11 = sshll.u32 %s304_s10, 4  ;;  %s225_s11 = int_to_ptr.vmem [resolvable:$true] %s224_s11 }
   0x7   :  { %v189_v11 = vld [vmem:[%s416_s6] sm:$0x3]  ;;  %v116_v51 = vld [vmem:[%s413_s3 + $0x10] sm:$0xff]  ;;  %v115_v52 = vld [vmem:[%s413_s3 + $0x8] sm:$0xff] }
   0x8   :  { %v27_v13 = vld [vmem:[%s410_s0] sm:$0x3]  ;;  %v117_v53 = vld [vmem:[%s413_s3 + $0x18] sm:$0xff] }
   0x9   :  { %v56_v16 = vperm.slane %v27_v13, 0  ;;  %v101_v18 = vperm.slane %v27_v13, 1  ;;  %v118_v38 = vld [vmem:[%s414_s4] sm:$0xff] }
   0xa   :  { %253 = vset.pattern.permute.xlu1 %v303_v6  ;;  %v114_v49 = vld [vmem:[%s413_s3] sm:$0xff] }
   0xb   :  { %48 = vperm.xlu0 %251, %v30_v4   ;;  %73 = vperm.xlu2 %254, %v34_v5   ;;  %v188_v5 = vld [vmem:[%s415_s5] sm:$0x3] }
   0xc   :  { %98 = vperm.xlu1 %253, %v31_v1  }
  0x13   :  { %255 = vset.pattern.permute.xlu0 %v303_v6  ;;  %68 = vperm.xlu2 %254, %v33_v7  }
  0x14   :  { %256 = vset.pattern.permute.xlu1 %v302_v3  ;;  %94 = vperm.xlu0 %255, %v30_v4  }
  0x15   :  { %38 = vperm.xlu1 %256, %v28_v8  }
  0x1b   :  { %63 = vperm.xlu2 %254, %v32_v9  }
  0x1c   :  { %86 = vperm.xlu0 %255, %v28_v8  }
  0x1d   :  { %257 = vset.pattern.permute.xlu1 %v303_v6 }
  0x1e   :  { %90 = vperm.xlu1 %257, %v29_v2  }
  0x23   :  { %134 = vperm.xlu2 %254, %v120_v10  }
  0x24   :  { %259 = vset.pattern.permute.xlu0 %v302_v3 }
  0x25   :  { %129 = vperm.xlu0 %259, %v119_v34  }
  0x26   :  { %258 = vset.pattern.permute.xlu1 %v302_v3 }
  0x27   :  { %139 = vperm.xlu1 %258, %v121_v31  }
  0x2b   :  { %192 = vperm.xlu2 %254, %v189_v11  }
  0x2f   :  { %124 = vperm.xlu1 %258, %v118_v38  }
  0x5d   :  { %v44_v12 = vpop.permute.xlu2 %43 }
  0x5e   :  { %v58_v35 = vmul.f32 %v56_v16, %v44_v12 }
  0x65   :  { %v74_v19 = vpop.permute.xlu2 %73 }
  0x6d   :  { %v69_v26 = vpop.permute.xlu2 %68 }
  0x6e   :  { %v82_v43 = vadd.f32 %v69_v26, %v58_v35 }
  0x74   :  { %v79_v14 = vpop.permute.xlu1 %78 }
  0x75   :  { %v54_v15 = vpop.permute.xlu0 %53  ;;  %v64_v40 = vpop.permute.xlu2 %63 }
  0x76   :  { %v60_v17 = vmul.f32 %v56_v16, %v54_v15 }
  0x78   :  { %v84_v22 = vadd.f32 %v79_v14, %v60_v17 }
  0x7d   :  { %v49_v20 = vpop.permute.xlu0 %48  ;;  %v135_v58 = vpop.permute.xlu2 %134 }
  0x7e   :  { %v99_v21 = vpop.permute.xlu1 %98  ;;  %v59_v25 = vmul.f32 %v56_v16, %v49_v20 }
  0x7f   :  { %v105_v23 = vmul.f32 %v101_v18, %v99_v21 }
  0x80   :  { %v83_v28 = vadd.f32 %v74_v19, %v59_v25 }
  0x81   :  { %v109_v24 = vadd.f32 %v105_v23, %v84_v22 }
  0x83   :  { %260 = vtanh.f32 %v109_v24 }
  0x85   :  { %v193_v7 = vpop.permute.xlu2 %192 }
  0x86   :  { %v95_v27 = vpop.permute.xlu0 %94 }
  0x87   :  { %v104_v29 = vmul.f32 %v101_v18, %v95_v27  ;;  %v39_v30 = vpop.permute.xlu1 %38 }
  0x88   :  { %v57_v36 = vmul.f32 %v56_v16, %v39_v30 }
  0x89   :  { %v261_v32 = vpop.eup %260  ;;  %v108_v33 = vadd.f32 %v104_v29, %v83_v28 }
  0x8a   :  { %167 = vmatpush.msra.mxu0 %v261_v32  ;;  %240 = vmatpush.msra.mxu2 %v261_v32  ;;  %v81_v44 = vadd.f32 %v64_v40, %v57_v36 }
  0x8b   :  { %262 = vtanh.f32 %v108_v33  ;;  %241 = vmatpush.msra.mxu3 %v261_v32 }
  0x8e   :  { %v87_v37 = vpop.permute.xlu0 %86 }
  0x8f   :  { %v102_v39 = vmul.f32 %v101_v18, %v87_v37 }
  0x90   :  { %v91_v41 = vpop.permute.xlu1 %90 }
  0x91   :  { %v263_v42 = vpop.eup %262  ;;  %v103_v45 = vmul.f32 %v101_v18, %v91_v41  ;;  %v106_v46 = vadd.f32 %v102_v39, %v81_v44 }
  0x92   :  { %168 = vmatpush.msra.mxu0 %v263_v42  ;;  %242 = vmatpush.msra.mxu2 %v263_v42 }
  0x93   :  { %v107_v47 = vadd.f32 %v103_v45, %v82_v43  ;;  %243 = vmatpush.msra.mxu3 %v263_v42 }
  0x95   :  { %264 = vtanh.f32 %v107_v47 }
  0x96   :  { %266 = vtanh.f32 %v106_v46 }
  0x97   :  { %v130_v56 = vpop.permute.xlu0 %129 }
  0x99   :  { %v140_v54 = vpop.permute.xlu1 %139 }
  0x9b   :  { %v265_v48 = vpop.eup %264 }
  0x9c   :  { %169 = vmatpush.msra.mxu0 %v265_v48  ;;  %244 = vmatpush.msra.mxu2 %v265_v48  ;;  %v267_v50 = vpop.eup %266 }
  0x9d   :  { %245 = vmatpush.msra.mxu3 %v265_v48 }
  0x9e   :  { %170 = vmatpush.msra.mxu0 %v267_v50  ;;  %246 = vmatpush.msra.mxu2 %v267_v50 }
  0x9f   :  { %247 = vmatpush.msra.mxu3 %v267_v50  ;;  %235 = vmatmul.msk.f32.vlgmr.msra.gmra.mxu0 %vm142_vm0, %v114_v49 }
  0xa0   :  { %237 = vmatmul.msk.f32.vlgmr.msra.gmra.mxu3 %vm142_vm0, %v116_v51  ;;  %236 = vmatmul.msk.f32.vlgmr.msra.gmra.mxu2 %vm142_vm0, %v115_v52 }
  0xa1   :  { %v125_v63 = vpop.permute.xlu1 %124 }
  0xa8   :  { %238 = vmatmul.msk.f32.gmra.mxu3 %vm142_vm0, %v117_v53 }
 0x11c   :  { %v172_v0 = vpop.f32.mrf.mxu0 }
 0x11d   :  { %v173_v1 = vadd.f32 %v172_v0, %v125_v63 }
 0x123   :  { %v178_v55 = vpop.f32.mrf.mxu3  ;;  %v175_v57 = vpop.f32.mrf.mxu2 }
 0x124   :  { %v179_v59 = vadd.f32 %v178_v55, %v135_v58  ;;  %v176_v62 = vadd.f32 %v175_v57, %v130_v56 }
 0x12b   :  { %v181_v60 = vpop.f32.mrf.mxu3 }
 0x12c   :  { %v182_v61 = vadd.f32 %v181_v60, %v140_v54 }
 0x12e   :  { %268 = vtanh.f32 %v182_v61 }
 0x12f   :  { %270 = vtanh.f32 %v179_v59 }
 0x130   :  { %272 = vtanh.f32 %v176_v62 }
 0x131   :  { %274 = vtanh.f32 %v173_v1 }
 0x134   :  { %v269_v2 = vpop.eup %268 }
 0x135   :  { %v271_v3 = vpop.eup %270  ;;  %210 = vmatpush.msra.mxu1 %v269_v2 }
 0x136   :  { %v273_v4 = vpop.eup %272 }
 0x137   :  { %211 = vmatpush.msra.mxu1 %v271_v3  ;;  %v275_v6 = vpop.eup %274 }
 0x139   :  { %212 = vmatpush.msra.mxu1 %v273_v4 }
 0x13b   :  { %213 = vmatpush.msra.mxu1 %v275_v6 }
 0x13c   :  { %239 = vmatmul.msk.f32.vlgmr.msra.gmra.mxu1 %vm142_vm0, %v188_v5 }
 0x1b9   :  { %v215_v8 = vpop.f32.mrf.mxu1 }
 0x1ba   :  { %v216_v9 = vadd.f32 %v215_v8, %v193_v7 }
 0x1bc   :  { %218 = vst [vmem:[#allocation2] sm:$0x3] %v216_v9 }
 0x1bd   :  { %229 = dma.vmem_to_hbm [thread:$0]  %s225_s11, 32, %s227_s14, [#allocation3]  }
 0x1be   :  { %300 = dma.done.wait [#allocation3], 32  }
 0x1bf   :  { %301 = vsyncadd [#allocation3], 4294967264 }
 0x1c0   :  { %234 = vsyncpa [#allocation3], 1 }

</bundles_post_ra>
